<compile_context>
chip_gen: v7x
topology: tpu7x:2x2x1
jax: 0.10.0
libtpu: 0.0.40
codegen_flags: <defaults>
</compile_context>

<pallas_src>
import functools

import jax
import jax.numpy as jnp
from jax.experimental import pallas as pl
from jax.experimental.pallas import tpu as pltpu


def make_divisible(v, divisor=8, min_value=None, round_limit=0.9):
    min_value = min_value or divisor
    new_v = max(min_value, int(v + divisor / 2) // divisor * divisor)
    if new_v < round_limit * v:
        new_v += divisor
    return new_v


# ----------------------------- Pallas kernel ------------------------------- #
def mbconv_kernel(x_ref, w_pw_ref, bn1b_ref, w_dw_ref, bn2b_ref,
                  se_w1_ref, se_b1_ref, se_w2_ref, se_b2_ref,
                  w_pwl_ref, bn3b_ref, o_ref,
                  *, K, W, has_residual):
    P = K // 2
    x = x_ref[0]                                    # (Cin, HW)  lane-dense block
    HW = x.shape[1]

    # --- conv_pw (1x1): (Chid, Cin) @ (Cin, HW); BN1 scale pre-folded ---
    h = jnp.dot(w_pw_ref[...], x, preferred_element_type=jnp.float32)
    h = jnp.maximum(h + bn1b_ref[...], 0.0)         # (Chid, HW)

    # --- depthwise KxK, stride 1, pad P, entirely in registers ---
    # Each tap: lane-roll of h by the flattened spatial offset (XLU slot), then
    # a single MAC against the pre-masked, BN2-scaled tap weight (Chid, HW).
    dw = h * w_dw_ref[P * K + P]                    # centre tap (shift 0)
    for di in range(K):
        for dj in range(K):
            t = (di - P) * W + (dj - P)             # flattened spatial shift
            if t == 0:
                continue
            # pltpu.roll follows jnp.roll semantics:
            #   roll(h, s)[..., p] == h[..., (p - s) % HW]
            dw = dw + pltpu.roll(h, (-t) % HW, axis=1) * w_dw_ref[di * K + dj]
    h2 = jnp.maximum(dw + bn2b_ref[...], 0.0)       # (Chid, HW)

    # --- SE: global avg pool over lanes, 2-layer MLP, sigmoid gate ---
    pooled = jnp.mean(h2, axis=1, keepdims=True)    # (Chid, 1)
    se = jnp.dot(se_w1_ref[...], pooled,
                 preferred_element_type=jnp.float32) + se_b1_ref[...]
    se = jnp.maximum(se, 0.0)                       # (Crd, 1)
    se = jnp.dot(se_w2_ref[...], se,
                 preferred_element_type=jnp.float32) + se_b2_ref[...]
    se = jax.nn.sigmoid(se)                         # (Chid, 1)
    h3 = h2 * se

    # --- conv_pwl (1x1) + BN3 bias (+ residual) ---
    out = jnp.dot(w_pwl_ref[...], h3,
                  preferred_element_type=jnp.float32) + bn3b_ref[...]
    if has_residual:
        # TODO(synk): drop_path_rate defaults to 0.0 -> identity in eval mode.
        out = out + x
    o_ref[0] = out                                  # (Cout, HW) lane-dense store


# ------------------------------ wrapper ------------------------------------ #
def mbconv_forward(x_nchw, params, *, kernel_size, has_residual):
    N, Cin, H, W = x_nchw.shape
    K = kernel_size
    P = K // 2
    HW = H * W
    Chid = params['w_pw'].shape[1]
    Crd = params['se_w1'].shape[1]
    Cout = params['w_pwl'].shape[1]

    # NCHW -> (N, C, H*W): pure reshape, no transpose at the boundary.
    x = x_nchw.reshape(N, Cin, HW)

    # Fold the eval-mode BN scales into the conv weights; only the per-channel
    # bias adds remain inside the kernel.
    w_pw = (params['w_pw'] * params['bn1_s']).T                       # (Chid, Cin)
    w_pwl = (params['w_pwl'] * params['bn3_s']).T                     # (Cout, Chid)
    bn1_b = params['bn1_b'].reshape(Chid, 1)
    bn2_b = params['bn2_b'].reshape(Chid, 1)
    bn3_b = params['bn3_b'].reshape(Cout, 1)
    se_w1 = params['se_w1'].T                                         # (Crd, Chid)
    se_b1 = params['se_b1'].reshape(Crd, 1)
    se_w2 = params['se_w2'].T                                         # (Chid, Crd)
    se_b2 = params['se_b2'].reshape(Chid, 1)

    # Depthwise tap weights with BN2 scale and the spatial-border {0,1} masks
    # pre-folded, one (Chid, HW) slab per tap -> a single MAC per tap in-kernel.
    w_dw_scaled = params['w_dw'] * params['bn2_s'].reshape(1, 1, Chid)  # (K,K,Chid)
    pos = jnp.arange(HW, dtype=jnp.int32)
    rows, cols = pos // W, pos % W
    taps = []
    for di in range(K):
        for dj in range(K):
            r = rows + (di - P)
            c = cols + (dj - P)
            mask = ((r >= 0) & (r < H) & (c >= 0) & (c < W)).astype(jnp.float32)
            taps.append(w_dw_scaled[di, dj][:, None] * mask[None, :])   # (Chid, HW)
    w_dw_m = jnp.stack(taps, axis=0)                                    # (K*K, Chid, HW)

    weight_args = [w_pw, bn1_b, w_dw_m, bn2_b, se_w1, se_b1, se_w2, se_b2,
                   w_pwl, bn3_b]

    def full_spec(arr):
        nd = arr.ndim
        return pl.BlockSpec(arr.shape, lambda n, _nd=nd: (0,) * _nd)

    in_specs = ([pl.BlockSpec((1, Cin, HW), lambda n: (n, 0, 0))] +
                [full_spec(a) for a in weight_args])

    flops = int(N * (2 * HW * Chid * (Cin + K * K + Cout)     # convs
                     + 4 * Chid * Crd                         # SE MLP
                     + 6 * HW * Chid))                        # elementwise
    transcendentals = int(N * Chid)                           # sigmoid
    bytes_accessed = int(4 * (N * (Cin + Cout) * HW
                              + sum(int(a.size) for a in weight_args)))

    out = pl.pallas_call(
        functools.partial(mbconv_kernel, K=K, W=W, has_residual=has_residual),
        out_shape=jax.ShapeDtypeStruct((N, Cout, HW), jnp.float32),
        grid_spec=pltpu.PrefetchScalarGridSpec(
            num_scalar_prefetch=0,
            grid=(N,),
            in_specs=in_specs,
            out_specs=pl.BlockSpec((1, Cout, HW), lambda n: (n, 0, 0)),
        ),
        compiler_params=pltpu.CompilerParams(
            dimension_semantics=("parallel",)),
        cost_estimate=pl.CostEstimate(flops=flops,
                                      transcendentals=transcendentals,
                                      bytes_accessed=bytes_accessed),
    )(x, *weight_args)
    # TODO(synk): for full EfficientNet-sized inputs add an H-strip grid axis
    # with halo handling and v7x-specific (<=32 MiB scoped VMEM) tile sizing;
    # unnecessary at this working-set size (a few hundred KB per grid step).
    return out.reshape(N, Cout, H, W)


# ------------------------- parameter initialization ------------------------ #
def fold_bn(gamma, beta, mean, var, eps=1e-5):
    scale = gamma / jnp.sqrt(var + eps)
    bias = beta - mean * scale
    return scale[None, :], bias[None, :]


def init_params(key, Cin, Cout, K, exp_ratio=4.0, rd_ratio=1 / 16.0, rd_divisor=4):
    Chid = make_divisible(Cin * exp_ratio)
    Crd = make_divisible(Chid * rd_ratio, rd_divisor, round_limit=0.0)
    ks = jax.random.split(key, 16)

    def bn(k, c):
        k1, k2, k3, k4 = jax.random.split(k, 4)
        gamma = jax.random.uniform(k1, (c,), minval=0.8, maxval=1.2)
        beta = 0.1 * jax.random.normal(k2, (c,))
        mean = 0.1 * jax.random.normal(k3, (c,))
        var = jax.random.uniform(k4, (c,), minval=0.5, maxval=1.5)
        return fold_bn(gamma, beta, mean, var)

    bn1_s, bn1_b = bn(ks[0], Chid)
    bn2_s, bn2_b = bn(ks[1], Chid)
    bn3_s, bn3_b = bn(ks[2], Cout)

    params = dict(
        w_pw=0.2 * jax.random.normal(ks[3], (Cin, Chid)),       # conv_pw [Chid,Cin,1,1]^T
        bn1_s=bn1_s, bn1_b=bn1_b,
        w_dw=0.2 * jax.random.normal(ks[4], (K, K, Chid)),       # depthwise [Chid,1,K,K]
        bn2_s=bn2_s, bn2_b=bn2_b,
        se_w1=0.2 * jax.random.normal(ks[5], (Chid, Crd)),       # SE fc1
        se_b1=0.05 * jax.random.normal(ks[6], (1, Crd)),
        se_w2=0.2 * jax.random.normal(ks[7], (Crd, Chid)),       # SE fc2
        se_b2=0.05 * jax.random.normal(ks[8], (1, Chid)),
        w_pwl=0.2 * jax.random.normal(ks[9], (Chid, Cout)),      # conv_pwl [Cout,Chid,1,1]^T
        bn3_s=bn3_s, bn3_b=bn3_b,
    )
    return jax.tree.map(lambda a: a.astype(jnp.float32), params), Chid, Crd


# --------------------------- pure-JAX reference ----------------------------- #
def ref_forward(x_nchw, params, *, kernel_size, has_residual):
    K = kernel_size
    Chid = params['w_pw'].shape[1]
    x = jnp.transpose(x_nchw, (0, 2, 3, 1))
    h = jnp.einsum('nhwc,cd->nhwd', x, params['w_pw'])
    h = jnp.maximum(h * params['bn1_s'] + params['bn1_b'], 0.0)
    h = jax.lax.conv_general_dilated(
        h, params['w_dw'].reshape(K, K, 1, Chid),
        window_strides=(1, 1), padding=((K // 2, K // 2), (K // 2, K // 2)),
        dimension_numbers=('NHWC', 'HWIO', 'NHWC'), feature_group_count=Chid)
    h = jnp.maximum(h * params['bn2_s'] + params['bn2_b'], 0.0)
    pooled = h.mean(axis=(1, 2))                                   # (N, Chid)
    se = jnp.maximum(pooled @ params['se_w1'] + params['se_b1'], 0.0)
    se = jax.nn.sigmoid(se @ params['se_w2'] + params['se_b2'])
    h = h * se[:, None, None, :]
    out = jnp.einsum('nhwc,cd->nhwd', h, params['w_pwl'])
    out = out * params['bn3_s'] + params['bn3_b']
    if has_residual:
        out = out + x
    return jnp.transpose(out, (0, 3, 1, 2))


# ---------------------------------- main ------------------------------------ #
if __name__ == "__main__":
    N, Cin, H, W = 2, 4, 16, 16
    Cout, K, stride = 4, 3, 1
    has_residual = (Cin == Cout and stride == 1)

    key = jax.random.PRNGKey(0)
    kx, kp = jax.random.split(key)
    x = jax.random.normal(kx, (N, Cin, H, W), dtype=jnp.float32)
    params, Chid, Crd = init_params(kp, Cin, Cout, K)

    out = mbconv_forward(x, params, kernel_size=K, has_residual=has_residual)
    out = jax.block_until_ready(out)

    ref = ref_forward(x, params, kernel_size=K, has_residual=has_residual)
    assert out.shape == (N, Cout, H, W)
    assert jnp.allclose(out, ref, atol=1e-4, rtol=1e-4), \
        f"max abs err {jnp.max(jnp.abs(out - ref))}"

    print("KERNEL_OK")
</pallas_src>

<mosaic_0001>
module attributes {stable_mosaic.version = 11 : i64} {
  func.func @mbconv_kernel(%arg0: i32, %arg1: memref<1x4x256xf32, #tpu.memory_space<vmem>>, %arg2: memref<16x4xf32, #tpu.memory_space<vmem>>, %arg3: memref<16x1xf32, #tpu.memory_space<vmem>>, %arg4: memref<9x16x256xf32, #tpu.memory_space<vmem>>, %arg5: memref<16x1xf32, #tpu.memory_space<vmem>>, %arg6: memref<4x16xf32, #tpu.memory_space<vmem>>, %arg7: memref<4x1xf32, #tpu.memory_space<vmem>>, %arg8: memref<16x4xf32, #tpu.memory_space<vmem>>, %arg9: memref<16x1xf32, #tpu.memory_space<vmem>>, %arg10: memref<4x16xf32, #tpu.memory_space<vmem>>, %arg11: memref<4x1xf32, #tpu.memory_space<vmem>>, %arg12: memref<1x4x256xf32, #tpu.memory_space<vmem>>) attributes {dimension_semantics = [#tpu.dimension_semantics<parallel>], iteration_bounds = array<i64: 2>, scalar_prefetch = 0 : i64, scratch_operands = 0 : i64, tpu.core_type = #tpu.core_type<tc>, window_params = [{transform_indices = @transform_0, window_bounds = array<i64: 1, 4, 256>}, {pipeline_mode = #tpu.pipeline_mode<synchronous>, transform_indices = @transform_1, window_bounds = array<i64: 16, 4>}, {pipeline_mode = #tpu.pipeline_mode<synchronous>, transform_indices = @transform_2, window_bounds = array<i64: 16, 1>}, {pipeline_mode = #tpu.pipeline_mode<synchronous>, transform_indices = @transform_3, window_bounds = array<i64: 9, 16, 256>}, {pipeline_mode = #tpu.pipeline_mode<synchronous>, transform_indices = @transform_4, window_bounds = array<i64: 16, 1>}, {pipeline_mode = #tpu.pipeline_mode<synchronous>, transform_indices = @transform_5, window_bounds = array<i64: 4, 16>}, {pipeline_mode = #tpu.pipeline_mode<synchronous>, transform_indices = @transform_6, window_bounds = array<i64: 4, 1>}, {pipeline_mode = #tpu.pipeline_mode<synchronous>, transform_indices = @transform_7, window_bounds = array<i64: 16, 4>}, {pipeline_mode = #tpu.pipeline_mode<synchronous>, transform_indices = @transform_8, window_bounds = array<i64: 16, 1>}, {pipeline_mode = #tpu.pipeline_mode<synchronous>, transform_indices = @transform_9, window_bounds = array<i64: 4, 16>}, {pipeline_mode = #tpu.pipeline_mode<synchronous>, transform_indices = @transform_10, window_bounds = array<i64: 4, 1>}, {transform_indices = @transform_11, window_bounds = array<i64: 1, 4, 256>}]} {
    %c0 = arith.constant 0 : index
    %c0_0 = arith.constant 0 : index
    %c0_1 = arith.constant 0 : index
    %0 = vector.load %arg1[%c0, %c0_0, %c0_1] : memref<1x4x256xf32, #tpu.memory_space<vmem>>, vector<1x4x256xf32>
    %1 = vector.shape_cast %0 : vector<1x4x256xf32> to vector<4x256xf32>
    %c0_2 = arith.constant 0 : index
    %c0_3 = arith.constant 0 : index
    %2 = vector.load %arg2[%c0_2, %c0_3] : memref<16x4xf32, #tpu.memory_space<vmem>>, vector<16x4xf32>
    %cst = arith.constant dense<0.000000e+00> : vector<16x256xf32>
    %3 = tpu.matmul %2, %1, %cst {dimension_numbers = #tpu.dot_dimension_numbers<[1], [0], [0], [1], [0, 0, 1, 1], [], []>} : vector<16x4xf32>, vector<4x256xf32>, vector<16x256xf32> -> vector<16x256xf32>
    %c0_4 = arith.constant 0 : index
    %c0_5 = arith.constant 0 : index
    %4 = vector.load %arg3[%c0_4, %c0_5] : memref<16x1xf32, #tpu.memory_space<vmem>>, vector<16x1xf32>
    %5 = vector.broadcast %4 : vector<16x1xf32> to vector<16x256xf32>
    %6 = arith.addf %3, %5 : vector<16x256xf32>
    %cst_6 = arith.constant 0.000000e+00 : f32
    %7 = vector.broadcast %cst_6 : f32 to vector<16x256xf32>
    %8 = arith.maximumf %6, %7 : vector<16x256xf32>
    %c4 = arith.constant 4 : index
    %c0_7 = arith.constant 0 : index
    %c0_8 = arith.constant 0 : index
    %9 = vector.load %arg4[%c4, %c0_7, %c0_8] : memref<9x16x256xf32, #tpu.memory_space<vmem>>, vector<1x16x256xf32>
    %10 = vector.shape_cast %9 : vector<1x16x256xf32> to vector<16x256xf32>
    %11 = arith.mulf %8, %10 : vector<16x256xf32>
    %c17_i32 = arith.constant 17 : i32
    %12 = tpu.dynamic_rotate %8 by %c17_i32 dim 1 : vector<16x256xf32>, i32 -> vector<16x256xf32>
    %c0_9 = arith.constant 0 : index
    %c0_10 = arith.constant 0 : index
    %c0_11 = arith.constant 0 : index
    %13 = vector.load %arg4[%c0_9, %c0_10, %c0_11] : memref<9x16x256xf32, #tpu.memory_space<vmem>>, vector<1x16x256xf32>
    %14 = vector.shape_cast %13 : vector<1x16x256xf32> to vector<16x256xf32>
    %15 = arith.mulf %12, %14 : vector<16x256xf32>
    %16 = arith.addf %11, %15 : vector<16x256xf32>
    %c16_i32 = arith.constant 16 : i32
    %17 = tpu.dynamic_rotate %8 by %c16_i32 dim 1 : vector<16x256xf32>, i32 -> vector<16x256xf32>
    %c1 = arith.constant 1 : index
    %c0_12 = arith.constant 0 : index
    %c0_13 = arith.constant 0 : index
    %18 = vector.load %arg4[%c1, %c0_12, %c0_13] : memref<9x16x256xf32, #tpu.memory_space<vmem>>, vector<1x16x256xf32>
    %19 = vector.shape_cast %18 : vector<1x16x256xf32> to vector<16x256xf32>
    %20 = arith.mulf %17, %19 : vector<16x256xf32>
    %21 = arith.addf %16, %20 : vector<16x256xf32>
    %c15_i32 = arith.constant 15 : i32
    %22 = tpu.dynamic_rotate %8 by %c15_i32 dim 1 : vector<16x256xf32>, i32 -> vector<16x256xf32>
    %c2 = arith.constant 2 : index
    %c0_14 = arith.constant 0 : index
    %c0_15 = arith.constant 0 : index
    %23 = vector.load %arg4[%c2, %c0_14, %c0_15] : memref<9x16x256xf32, #tpu.memory_space<vmem>>, vector<1x16x256xf32>
    %24 = vector.shape_cast %23 : vector<1x16x256xf32> to vector<16x256xf32>
    %25 = arith.mulf %22, %24 : vector<16x256xf32>
    %26 = arith.addf %21, %25 : vector<16x256xf32>
    %c1_i32 = arith.constant 1 : i32
    %27 = tpu.dynamic_rotate %8 by %c1_i32 dim 1 : vector<16x256xf32>, i32 -> vector<16x256xf32>
    %c3 = arith.constant 3 : index
    %c0_16 = arith.constant 0 : index
    %c0_17 = arith.constant 0 : index
    %28 = vector.load %arg4[%c3, %c0_16, %c0_17] : memref<9x16x256xf32, #tpu.memory_space<vmem>>, vector<1x16x256xf32>
    %29 = vector.shape_cast %28 : vector<1x16x256xf32> to vector<16x256xf32>
    %30 = arith.mulf %27, %29 : vector<16x256xf32>
    %31 = arith.addf %26, %30 : vector<16x256xf32>
    %c255_i32 = arith.constant 255 : i32
    %32 = tpu.dynamic_rotate %8 by %c255_i32 dim 1 : vector<16x256xf32>, i32 -> vector<16x256xf32>
    %c5 = arith.constant 5 : index
    %c0_18 = arith.constant 0 : index
    %c0_19 = arith.constant 0 : index
    %33 = vector.load %arg4[%c5, %c0_18, %c0_19] : memref<9x16x256xf32, #tpu.memory_space<vmem>>, vector<1x16x256xf32>
    %34 = vector.shape_cast %33 : vector<1x16x256xf32> to vector<16x256xf32>
    %35 = arith.mulf %32, %34 : vector<16x256xf32>
    %36 = arith.addf %31, %35 : vector<16x256xf32>
    %c241_i32 = arith.constant 241 : i32
    %37 = tpu.dynamic_rotate %8 by %c241_i32 dim 1 : vector<16x256xf32>, i32 -> vector<16x256xf32>
    %c6 = arith.constant 6 : index
    %c0_20 = arith.constant 0 : index
    %c0_21 = arith.constant 0 : index
    %38 = vector.load %arg4[%c6, %c0_20, %c0_21] : memref<9x16x256xf32, #tpu.memory_space<vmem>>, vector<1x16x256xf32>
    %39 = vector.shape_cast %38 : vector<1x16x256xf32> to vector<16x256xf32>
    %40 = arith.mulf %37, %39 : vector<16x256xf32>
    %41 = arith.addf %36, %40 : vector<16x256xf32>
    %c240_i32 = arith.constant 240 : i32
    %42 = tpu.dynamic_rotate %8 by %c240_i32 dim 1 : vector<16x256xf32>, i32 -> vector<16x256xf32>
    %c7 = arith.constant 7 : index
    %c0_22 = arith.constant 0 : index
    %c0_23 = arith.constant 0 : index
    %43 = vector.load %arg4[%c7, %c0_22, %c0_23] : memref<9x16x256xf32, #tpu.memory_space<vmem>>, vector<1x16x256xf32>
    %44 = vector.shape_cast %43 : vector<1x16x256xf32> to vector<16x256xf32>
    %45 = arith.mulf %42, %44 : vector<16x256xf32>
    %46 = arith.addf %41, %45 : vector<16x256xf32>
    %c239_i32 = arith.constant 239 : i32
    %47 = tpu.dynamic_rotate %8 by %c239_i32 dim 1 : vector<16x256xf32>, i32 -> vector<16x256xf32>
    %c8 = arith.constant 8 : index
    %c0_24 = arith.constant 0 : index
    %c0_25 = arith.constant 0 : index
    %48 = vector.load %arg4[%c8, %c0_24, %c0_25] : memref<9x16x256xf32, #tpu.memory_space<vmem>>, vector<1x16x256xf32>
    %49 = vector.shape_cast %48 : vector<1x16x256xf32> to vector<16x256xf32>
    %50 = arith.mulf %47, %49 : vector<16x256xf32>
    %51 = arith.addf %46, %50 : vector<16x256xf32>
    %c0_26 = arith.constant 0 : index
    %c0_27 = arith.constant 0 : index
    %52 = vector.load %arg5[%c0_26, %c0_27] : memref<16x1xf32, #tpu.memory_space<vmem>>, vector<16x1xf32>
    %53 = vector.broadcast %52 : vector<16x1xf32> to vector<16x256xf32>
    %54 = arith.addf %51, %53 : vector<16x256xf32>
    %cst_28 = arith.constant 0.000000e+00 : f32
    %55 = vector.broadcast %cst_28 : f32 to vector<16x256xf32>
    %56 = arith.maximumf %54, %55 : vector<16x256xf32>
    %cst_29 = arith.constant dense<0.000000e+00> : vector<16xf32>
    %57 = vector.multi_reduction <add>, %56, %cst_29 [1] : vector<16x256xf32> to vector<16xf32>
    %58 = vector.shape_cast %57 : vector<16xf32> to vector<16x1xf32>
    %cst_30 = arith.constant 2.560000e+02 : f32
    %59 = vector.broadcast %cst_30 : f32 to vector<16x1xf32>
    %60 = arith.divf %58, %59 : vector<16x1xf32>
    %c0_31 = arith.constant 0 : index
    %c0_32 = arith.constant 0 : index
    %61 = vector.load %arg6[%c0_31, %c0_32] : memref<4x16xf32, #tpu.memory_space<vmem>>, vector<4x16xf32>
    %cst_33 = arith.constant dense<0.000000e+00> : vector<4x1xf32>
    %62 = tpu.matmul %61, %60, %cst_33 {dimension_numbers = #tpu.dot_dimension_numbers<[1], [0], [0], [1], [0, 0, 1, 1], [], []>} : vector<4x16xf32>, vector<16x1xf32>, vector<4x1xf32> -> vector<4x1xf32>
    %c0_34 = arith.constant 0 : index
    %c0_35 = arith.constant 0 : index
    %63 = vector.load %arg7[%c0_34, %c0_35] : memref<4x1xf32, #tpu.memory_space<vmem>>, vector<4x1xf32>
    %64 = arith.addf %62, %63 : vector<4x1xf32>
    %cst_36 = arith.constant 0.000000e+00 : f32
    %65 = vector.broadcast %cst_36 : f32 to vector<4x1xf32>
    %66 = arith.maximumf %64, %65 : vector<4x1xf32>
    %c0_37 = arith.constant 0 : index
    %c0_38 = arith.constant 0 : index
    %67 = vector.load %arg8[%c0_37, %c0_38] : memref<16x4xf32, #tpu.memory_space<vmem>>, vector<16x4xf32>
    %cst_39 = arith.constant dense<0.000000e+00> : vector<16x1xf32>
    %68 = tpu.matmul %67, %66, %cst_39 {dimension_numbers = #tpu.dot_dimension_numbers<[1], [0], [0], [1], [0, 0, 1, 1], [], []>} : vector<16x4xf32>, vector<4x1xf32>, vector<16x1xf32> -> vector<16x1xf32>
    %c0_40 = arith.constant 0 : index
    %c0_41 = arith.constant 0 : index
    %69 = vector.load %arg9[%c0_40, %c0_41] : memref<16x1xf32, #tpu.memory_space<vmem>>, vector<16x1xf32>
    %70 = arith.addf %68, %69 : vector<16x1xf32>
    %71 = arith.negf %70 : vector<16x1xf32>
    %72 = math.exp %71 : vector<16x1xf32>
    %cst_42 = arith.constant 1.000000e+00 : f32
    %73 = vector.broadcast %cst_42 : f32 to vector<16x1xf32>
    %74 = arith.addf %73, %72 : vector<16x1xf32>
    %75 = arith.divf %73, %74 : vector<16x1xf32>
    %76 = vector.broadcast %75 : vector<16x1xf32> to vector<16x256xf32>
    %77 = arith.mulf %56, %76 : vector<16x256xf32>
    %c0_43 = arith.constant 0 : index
    %c0_44 = arith.constant 0 : index
    %78 = vector.load %arg10[%c0_43, %c0_44] : memref<4x16xf32, #tpu.memory_space<vmem>>, vector<4x16xf32>
    %cst_45 = arith.constant dense<0.000000e+00> : vector<4x256xf32>
    %79 = tpu.matmul %78, %77, %cst_45 {dimension_numbers = #tpu.dot_dimension_numbers<[1], [0], [0], [1], [0, 0, 1, 1], [], []>} : vector<4x16xf32>, vector<16x256xf32>, vector<4x256xf32> -> vector<4x256xf32>
    %c0_46 = arith.constant 0 : index
    %c0_47 = arith.constant 0 : index
    %80 = vector.load %arg11[%c0_46, %c0_47] : memref<4x1xf32, #tpu.memory_space<vmem>>, vector<4x1xf32>
    %81 = vector.broadcast %80 : vector<4x1xf32> to vector<4x256xf32>
    %82 = arith.addf %79, %81 : vector<4x256xf32>
    %83 = arith.addf %82, %1 : vector<4x256xf32>
    %c0_48 = arith.constant 0 : index
    %c0_49 = arith.constant 0 : index
    %c0_50 = arith.constant 0 : index
    %84 = vector.load %arg12[%c0_48, %c0_49, %c0_50] : memref<1x4x256xf32, #tpu.memory_space<vmem>>, vector<1x4x256xf32>
    %85 = vector.shape_cast %84 : vector<1x4x256xf32> to vector<4x256xf32>
    %86 = vector.shape_cast %83 : vector<4x256xf32> to vector<1x4x256xf32>
    tpu.vector_store %arg12[%c0_48, %c0_49, %c0_50], %86 {strides = array<i32>} : memref<1x4x256xf32, #tpu.memory_space<vmem>>, vector<1x4x256xf32>,
    return
  }
  func.func @transform_0(%arg0: i32) -> (i32, i32, i32) {
    %c0_i32 = arith.constant 0 : i32
    %c0_i32_0 = arith.constant 0 : i32
    %c0_i32_1 = arith.constant 0 : i32
    return %arg0, %c0_i32, %c0_i32_0 : i32, i32, i32
  }
  func.func @transform_1(%arg0: i32) -> (i32, i32) {
    %c0_i32 = arith.constant 0 : i32
    %c0_i32_0 = arith.constant 0 : i32
    %c0_i32_1 = arith.constant 0 : i32
    return %c0_i32, %c0_i32_0 : i32, i32
  }
  func.func @transform_2(%arg0: i32) -> (i32, i32) {
    %c0_i32 = arith.constant 0 : i32
    %c0_i32_0 = arith.constant 0 : i32
    %c0_i32_1 = arith.constant 0 : i32
    return %c0_i32, %c0_i32_0 : i32, i32
  }
  func.func @transform_3(%arg0: i32) -> (i32, i32, i32) {
    %c0_i32 = arith.constant 0 : i32
    %c0_i32_0 = arith.constant 0 : i32
    %c0_i32_1 = arith.constant 0 : i32
    %c0_i32_2 = arith.constant 0 : i32
    return %c0_i32, %c0_i32_0, %c0_i32_1 : i32, i32, i32
  }
  func.func @transform_4(%arg0: i32) -> (i32, i32) {
    %c0_i32 = arith.constant 0 : i32
    %c0_i32_0 = arith.constant 0 : i32
    %c0_i32_1 = arith.constant 0 : i32
    return %c0_i32, %c0_i32_0 : i32, i32
  }
  func.func @transform_5(%arg0: i32) -> (i32, i32) {
    %c0_i32 = arith.constant 0 : i32
    %c0_i32_0 = arith.constant 0 : i32
    %c0_i32_1 = arith.constant 0 : i32
    return %c0_i32, %c0_i32_0 : i32, i32
  }
  func.func @transform_6(%arg0: i32) -> (i32, i32) {
    %c0_i32 = arith.constant 0 : i32
    %c0_i32_0 = arith.constant 0 : i32
    %c0_i32_1 = arith.constant 0 : i32
    return %c0_i32, %c0_i32_0 : i32, i32
  }
  func.func @transform_7(%arg0: i32) -> (i32, i32) {
    %c0_i32 = arith.constant 0 : i32
    %c0_i32_0 = arith.constant 0 : i32
    %c0_i32_1 = arith.constant 0 : i32
    return %c0_i32, %c0_i32_0 : i32, i32
  }
  func.func @transform_8(%arg0: i32) -> (i32, i32) {
    %c0_i32 = arith.constant 0 : i32
    %c0_i32_0 = arith.constant 0 : i32
    %c0_i32_1 = arith.constant 0 : i32
    return %c0_i32, %c0_i32_0 : i32, i32
  }
  func.func @transform_9(%arg0: i32) -> (i32, i32) {
    %c0_i32 = arith.constant 0 : i32
    %c0_i32_0 = arith.constant 0 : i32
    %c0_i32_1 = arith.constant 0 : i32
    return %c0_i32, %c0_i32_0 : i32, i32
  }
  func.func @transform_10(%arg0: i32) -> (i32, i32) {
    %c0_i32 = arith.constant 0 : i32
    %c0_i32_0 = arith.constant 0 : i32
    %c0_i32_1 = arith.constant 0 : i32
    return %c0_i32, %c0_i32_0 : i32, i32
  }
  func.func @transform_11(%arg0: i32) -> (i32, i32, i32) {
    %c0_i32 = arith.constant 0 : i32
    %c0_i32_0 = arith.constant 0 : i32
    %c0_i32_1 = arith.constant 0 : i32
    return %arg0, %c0_i32, %c0_i32_0 : i32, i32, i32
  }
}

</mosaic_0001>

<bundles_post_ra>
// kernel: tpu_custom_call.1
= control target key start
LH: loop header
LB: loop body
LE: loop exit
PB: predicated region body
PF: predicated region fallthrough
CT: control target
= control target key end

     0   :  { %16 = vsyncpa [#allocation3], 0  ;;  %s1823_s0 = inlined_call_operand.vmem [shape: f32[2,4,256], index: 0, kind: input, shape index: {}]   ;;  %s1824_s1 = inlined_call_operand.vmem [shape: f32[16,4], index: 1, kind: input, shape index: {}]   ;;  %s1825_s2 = inlined_call_operand.vmem [shape: f32[16,1], index: 2, kind: input, shape index: {}]   ;;  %s1826_s3 = inlined_call_operand.hbm [shape: f32[9,16,256], index: 3, kind: input, shape index: {}]   ;;  %s1827_s4 = inlined_call_operand.vmem [shape: f32[16,1], index: 4, kind: input, shape index: {}]   ;;  %s1828_s5 = inlined_call_operand.vmem [shape: f32[4,16], index: 5, kind: input, shape index: {}]   ;;  %s1829_s6 = inlined_call_operand.vmem [shape: f32[4,1], index: 6, kind: input, shape index: {}]   ;;  %s1830_s7 = inlined_call_operand.vmem [shape: f32[16,4], index: 7, kind: input, shape index: {}]   ;;  %s1831_s8 = inlined_call_operand.vmem [shape: f32[16,1], index: 8, kind: input, shape index: {}]   ;;  %s1832_s9 = inlined_call_operand.vmem [shape: f32[4,16], index: 9, kind: input, shape index: {}]   ;;  %s1833_s10 = inlined_call_operand.vmem [shape: f32[4,1], index: 10, kind: input, shape index: {}]   ;;  %s1834_s11 = inlined_call_operand.hbm [shape: f32[2,4,256], index: 11, kind: output, shape index: {}]  }
   0x1   :  { %17 = vsyncpa [#allocation4], 0 }
   0x2   :  { %19 = vsyncpa [#allocation4 + $0x1], 0  ;;  %s1422_s17 = smov 0   ;;  %s1424_s18 = smov 0  }
   0x3   :  { %s1426_s19 = smov 0   ;;  %s1428_s20 = smov 0  }
   0x4 LB: > { %s1443_s21 = sadd.s32 4294967295, %s1344_s20   ;;  %s1123_s22 = sadd.s32 4294967294, %s1344_s20   ;;  %s1344_s20 = sphi %s1428_s20, %s1852_s20   ;;  %s1340_s19 = sphi %s1426_s19, %s1851_s19   ;;  %s1336_s18 = sphi %s1424_s18, %s1850_s18   ;;  %s1332_s17 = sphi %s1422_s17, %s1849_s17  }
   0x5   : > { %s1447_s23 = sadd.s32 1, %s1344_s20   ;;  %s268_s24 = sadd.s32 1, %s1340_s19 }
   0x6   : > { %s265_s25 = ssub.s32 %s1344_s20, %s1447_s23  ;;  %p278_p0 = scmp.ne.s32.totalorder %s1340_s19, %s1336_s18 }
   0x7   : > { %p266_p1 = scmp.eq.s32.totalorder %s265_s25, 0  ;;  %p279_p2 = scmp.eq.s32.totalorder %s1443_s21, 1 }
   0x8   : > { %p284_p3 = scmp.ne.s32.totalorder %s1336_s18, %s1332_s17  ;;  %p285_p4 = scmp.eq.s32.totalorder %s1123_s22, 1 }
   0x9   : > { %s1458_s26 = scalar_select %p266_p1, %s1340_s19, %s268_s24  }
   0xa   : > { %p1460_p5 = por %p279_p2, %p278_p0  ;;  %p1464_p6 = por %p285_p4, %p284_p3 }
   0xb   : > { %1838 = sst [smem:[#allocation8_spill]] %s1458_s26  ;;  %p1124_p7 = scmp.ge.s32.totalorder %s1344_s20, 1 }
   0xc   : > { %s1839_s27 = scalar_select %p1460_p5, 1, 0 }
   0xd   : > { %s1840_s28 = scalar_select %p1464_p6, 1, 0 }
   0xe   : > { %p292_p8 = scmp.lt.s32.totalorder %s1344_s20, 3  ;;  %p1835_p9 = scmp.eq.s32.totalorder %s1443_s21, 0 }
   0xf   : > { %s1346_s30 = smov [#allocation2]   ;;  %s1250_s16 = scalar_lea.hbm %s1826_s3, 4608 }
  0x10   : > { %p1471_p10 = pnand %p1124_p7, %p292_p8  ;;  %s310_s12 = sshll.u32 %s1346_s30, 4  ;;  %s311_s12 = int_to_ptr.vmem [resolvable:$true] %s310_s12 }
  0x11   : > { %p1251_p13 = scmp.ne.s32.totalorder %s1826_s3, %s1250_s16  ;;  %p1257_p3 = scmp.lt.u32.totalorder %s1250_s16, %s1826_s3 }
  0x12   : > { %s1841_s29 = scalar_select %p1471_p10, 1, 0 }
  0x13   : > { %p1181_p11 = pneg %p1471_p10 }
  0x15   : > { %p1479_p12 = pnand %p1835_p9, %p1181_p11 }
  0x17   : > { %p1252_p0 = pneg %p1479_p12 }
  0x19   : > { %p1253_p1 = pnand %p1252_p0, %p1251_p13 }
  0x1b   : > { %p1254_p2 = pneg %p1253_p1 }
  0x1d   : > { %p1259_p4 = pnand %p1257_p3, %p1254_p2 }
  0x1f   : > { %1262 = shalt.err (!%p1259_p4)
}
  0x20   : > { %s1263_s26 = scalar_lea.vmem %s311_s12, 4608  ;;  %p1271_p9 = scmp.lt.s32.totalorder %s311_s12, %s311_s12 }
  0x21   : > { %p1264_p7 = scmp.ne.s32.totalorder %s311_s12, %s1263_s26  ;;  %p1272_p6 = scmp.lt.s32.totalorder %s1263_s26, %s1263_s26 }
  0x23   : > { %p1266_p8 = pnand %p1264_p7, %p1252_p0  ;;  %p1273_p5 = por %p1272_p6, %p1271_p9 }
  0x25   : > { %p1267_p11 = pneg %p1266_p8 }
  0x27   : > { %p1274_p10 = pnand %p1273_p5, %p1267_p11 }
  0x29   : > { %1277 = shalt.err (!%p1274_p10)
}
  0x2a   : > { %s1347_s14 = smov 256   ;;  %s1348_s15 = smov 16  }
  0x2b   : > { %1184 = dma.hbm_to_vmem [thread:$0]  (!%p1479_p12), %s1826_s3, 4608, %s311_s12, [#allocation3], %s1347_s14, %s1347_s14, %s1348_s15  }
  0x2c   : > { %p1843_p13 = scmp.ne.s32.totalorder %s1841_s29, 0 }
  0x2d   : > { %p1844_p1 = scmp.eq.s32.totalorder (!%p1843_p13), %s1443_s21, 0 }
  0x2e   : > { %355 = sbr.rel (%p1843_p13) target bundleno = 1448 (0x5a8), region = 64 }
  0x35   : > { %1323 = dma.done.wait (%p1844_p1), [#allocation3], 4608   ;;  %p1845_p0 = pmov %p1844_p1 }
  0x36   : > { %p395_p5 = scmp.lt.s32.totalorder %s1443_s21, 1  ;;  %v1349_v0 = vmov 0.0   ;;  %v1350_v1 = vmov 0   ;;  %vm424_vm0 = vcmask 1043456   ;;  %v403_v4 = vld [vmem:[%s1825_s2] sm:$0xff]  ;;  %vm417_vm1 = vcmask 31744  }
  0x37   : > { %1325 = vsyncadd (%p1845_p0), [#allocation3], 4294962688  ;;  %493 = vmatprep.mubr.f32.mxu0 %v1349_v0  ;;  %1239 = vset.pattern.permute.xlu0 %v1350_v1  ;;  %v401_v5 = vld [vmem:[%s1824_s1] sm:$0xff]  ;;  %v729_v6 = vld [vmem:[%s1827_s4 + $0x8] sm:$0xff]  ;;  %s1351_s30 = smov 16   ;;  %s1352_s14 = smov 17   ;;  %v527_v40 = vlaneseq }
  0x38   : > { %s396_s26 = scalar_select %p395_p5, %s1443_s21, 1  ;;  %1240 = vset.pattern.permute.xlu1 %v1350_v1  ;;  %407 = vperm.xlu0 %1239, %v403_v4   ;;  %v404_v7 = vld [vmem:[%s1825_s2 + $0x8] sm:$0xff]  ;;  %v728_v9 = vld [vmem:[%s1827_s4] sm:$0xff]  ;;  %v513_v54 = vld [vmem:[#allocation2 + $0x90] sm:$0xff]  ;;  %vm1360_vm10 = vmmov 0   ;;  %vm759_vm11 = vcmask 130048  }
  0x39   : > { %737 = vperm.xlu1 %1240, %v729_v6   ;;  %v402_v8 = vld [vmem:[%s1824_s1 + $0x8] sm:$0xff]  ;;  %s1353_s15 = smov 15   ;;  %s1354_s22 = smov 1   ;;  %v1623_v43 = vand.u32 127, %v527_v40  ;;  %v534_v46 = vld [vmem:[#allocation2] sm:$0xff]  ;;  %v514_v55 = vld [vmem:[#allocation2 + $0x98] sm:$0xff]  ;;  %1160 = vmatprep.mubr.msk.f32.mxu1 %vm1360_vm10, %v1349_v0 }
  0x3a   : > { %s1148_s12 = sshll.u32 %s396_s26, 3  ;;  %s1355_s24 = smov 127   ;;  %v535_v47 = vld [vmem:[#allocation2 + $0x8] sm:$0xff]  ;;  %v511_v52 = vld [vmem:[#allocation2 + $0x80] sm:$0xff] }
  0x3b   : > { %s399_s16 = scalar_lea.vmem %s1823_s0, %s1148_s12  ;;  %s1356_s26 = smov 113   ;;  %vm529_vm2 = vcmp.lt.s32.totalorder %v1623_v43, 17  ;;  %vm554_vm3 = vcmp.lt.s32.totalorder %v1623_v43, 16  ;;  %v512_v53 = vld [vmem:[#allocation2 + $0x88] sm:$0xff]  ;;  %vm580_vm4 = vcmp.lt.s32.totalorder %v1623_v43, 15  ;;  %v560_v58 = vld [vmem:[#allocation2 + $0x20] sm:$0xff] }
  0x3c   : > { %v1511_v2 = vld [vmem:[%s399_s16] sm:$0xff]  ;;  %412 = vperm.xlu0 %1239, %v404_v7   ;;  %s1357_s12 = smov 112   ;;  %s1358_s13 = smov 111   ;;  %v561_v59 = vld [vmem:[#allocation2 + $0x28] sm:$0xff]  ;;  %vm606_vm5 = vcmp.lt.s32.totalorder %v1623_v43, 1  ;;  %vm632_vm6 = vcmp.lt.s32.totalorder %v1623_v43, 127 }
  0x3d   : > { %v1515_v3 = vcombine.high %v1511_v2, %v1511_v2  ;;  %v586_v6 = vld [vmem:[#allocation2 + $0x40] sm:$0xff]  ;;  %v587_v7 = vld [vmem:[#allocation2 + $0x48] sm:$0xff]  ;;  %vm658_vm7 = vcmp.lt.s32.totalorder %v1623_v43, 113  ;;  %vm684_vm8 = vcmp.lt.s32.totalorder %v1623_v43, 112  ;;  %vm710_vm9 = vcmp.lt.s32.totalorder %v1623_v43, 111  ;;  %p1846_p9 = scmp.ne.s32.totalorder %s1839_s27, 0 }
  0x3e   : > { %v1359_v43 = vmov 0.0|0.0  }
  0x3f   : > { %1132 = vmatprep.subr.msk.mxu0 %vm424_vm0, %v1515_v3  ;;  %1168 = vmatprep.subr.bf16.mxu1 %v1359_v43 }
  0x40   : > { %1133 = vmatpush1.msk.msra.mxu0 %vm424_vm0, %v1511_v2  ;;  %732 = vperm.xlu0 %1239, %v728_v9  }
  0x41   : > { %1134 = vmatmul.mubr.msk.f32.vlgmr.msra.gmra.mrb[0].mxu0 %vm417_vm1, %v401_v5 }
  0x42   : > { %499 = vmatprep.mubr.f32.mxu0 %v1349_v0 }
  0x45   : > { %1135 = vmatmul.mubr.msk.f32.gmra.mrb[2].mxu0 %vm417_vm1, %v402_v8 }
  0x46   : > { %1022 = vmatprep.mubr.f32.mxu0 %v1349_v0  ;;  %v758_v0 = vld [vmem:[%s1829_s6] sm:$0xf] }
  0xb7   : > { %v408_v10 = vpop.permute.xlu0 %407 }
  0xb8   : > { %v1599_v24 = vpop.permute.xlu1 %737 }
  0xbb   : > { %v413_v15 = vpop.permute.xlu0 %412 }
  0xbf   : > { %v1601_v25 = vpop.permute.xlu0 %732 }
 0x114   : > { %v495_v11 = vpop.f32.mrb[0].mxu0 }
 0x115   : > { %v496_v12 = vadd.f32 %v495_v11, %v408_v10  ;;  %v497_v13 = vpop.f32.mrb[1].mxu0 }
 0x116   : > { %v498_v20 = vadd.f32 %v497_v13, %v408_v10  ;;  %v536_v13 = vld [vmem:[#allocation2 + $0x10] sm:$0xff] }
 0x117   : > { %v1543_v14 = vmax.f32 %v496_v12, 0.0 }
 0x118   : > { %v501_v16 = vpop.f32.mrb[2].mxu0  ;;  %v1569_v21 = vmax.f32 %v498_v20, 0.0  ;;  %v613_v20 = vld [vmem:[#allocation2 + $0x68] sm:$0xff] }
 0x119   : > { %v502_v17 = vadd.f32 %v501_v16, %v413_v15  ;;  %v503_v18 = vpop.f32.mrb[3].mxu0  ;;  %546 = vrot.lane.b32.xlu0 %v1543_v14, %s1351_s30  ;;  %519 = vrot.lane.b32.xlu1 %v1543_v14, %s1352_s14  ;;  %v515_v63 = vmul.f32 %v511_v52, %v1543_v14 }
 0x11a   : > { %v504_v22 = vadd.f32 %v503_v18, %v413_v15  ;;  %v516_v62 = vmul.f32 %v512_v53, %v1569_v21  ;;  %v638_v53 = vld [vmem:[#allocation2 + $0xa0] sm:$0xff] }
 0x11b   : > { %v1549_v19 = vmax.f32 %v502_v17, 0.0 }
 0x11c   : > { %v1577_v23 = vmax.f32 %v504_v22, 0.0 }
 0x11d   : > { %572 = vrot.lane.b32.xlu0 %v1543_v14, %s1353_s15  ;;  %521 = vrot.lane.b32.xlu1 %v1549_v19, %s1352_s14  ;;  %v517_v1 = vmul.f32 %v513_v54, %v1549_v19  ;;  %v639_v54 = vld [vmem:[#allocation2 + $0xa8] sm:$0xff] }
 0x11e   : > { %v518_v10 = vmul.f32 %v514_v55, %v1577_v23 }
 0x121   : > { %598 = vrot.lane.b32.xlu0 %v1543_v14, %s1354_s22  ;;  %548 = vrot.lane.b32.xlu1 %v1549_v19, %s1351_s30 }
 0x125   : > { %624 = vrot.lane.b32.xlu0 %v1543_v14, %s1355_s24  ;;  %574 = vrot.lane.b32.xlu1 %v1549_v19, %s1353_s15 }
 0x129   : > { %650 = vrot.lane.b32.xlu0 %v1543_v14, %s1356_s26  ;;  %600 = vrot.lane.b32.xlu1 %v1549_v19, %s1354_s22 }
 0x12d   : > { %676 = vrot.lane.b32.xlu0 %v1543_v14, %s1357_s12  ;;  %626 = vrot.lane.b32.xlu1 %v1549_v19, %s1355_s24 }
 0x131   : > { %702 = vrot.lane.b32.xlu0 %v1543_v14, %s1358_s13  ;;  %652 = vrot.lane.b32.xlu1 %v1549_v19, %s1356_s26  ;;  %v537_v14 = vld [vmem:[#allocation2 + $0x18] sm:$0xff] }
 0x135   : > { %523 = vrot.lane.b32.xlu0 %v1569_v21, %s1352_s14  ;;  %678 = vrot.lane.b32.xlu1 %v1549_v19, %s1357_s12 }
 0x139   : > { %550 = vrot.lane.b32.xlu0 %v1569_v21, %s1351_s30  ;;  %704 = vrot.lane.b32.xlu1 %v1549_v19, %s1358_s13  ;;  %v612_v19 = vld [vmem:[#allocation2 + $0x60] sm:$0xff] }
 0x13d   : > { %576 = vrot.lane.b32.xlu0 %v1569_v21, %s1353_s15  ;;  %525 = vrot.lane.b32.xlu1 %v1577_v23, %s1352_s14 }
 0x141   : > { %602 = vrot.lane.b32.xlu0 %v1569_v21, %s1354_s22  ;;  %552 = vrot.lane.b32.xlu1 %v1577_v23, %s1351_s30 }
 0x145   : > { %628 = vrot.lane.b32.xlu0 %v1569_v21, %s1355_s24  ;;  %578 = vrot.lane.b32.xlu1 %v1577_v23, %s1353_s15  ;;  %s392_s15 = sand.u32 1, %s1336_s18  }
 0x146   : > { %s1038_s25 = scalar_lea.sflag [#allocation4], %s392_s15 }
 0x149   : > { %654 = vrot.lane.b32.xlu0 %v1569_v21, %s1356_s26  ;;  %604 = vrot.lane.b32.xlu1 %v1577_v23, %s1354_s22  ;;  %s1129_s22 = sshll.u32 %s392_s15, 3 }
 0x14d   : > { %680 = vrot.lane.b32.xlu0 %v1569_v21, %s1357_s12  ;;  %630 = vrot.lane.b32.xlu1 %v1577_v23, %s1355_s24  ;;  %s1149_s24 = sshll.u32 %s1443_s21, 7  ;;  %s1361_s21 = smov [#allocation5]  }
 0x14e   : > { %s1781_s16 = scalar_lea.hbm %s1834_s11, %s1149_s24  ;;  %s1282_s14 = sshll.u32 %s1361_s21, 4  ;;  %s1283_s14 = int_to_ptr.vmem [resolvable:$false] %s1282_s14 }
 0x151   : > { %706 = vrot.lane.b32.xlu0 %v1569_v21, %s1358_s13  ;;  %656 = vrot.lane.b32.xlu1 %v1577_v23, %s1356_s26  ;;  %s394_s26 = scalar_lea.vmem [#allocation5], %s1129_s22  ;;  %s1284_s22 = scalar_lea.vmem %s1283_s14, 256 }
 0x155   : > { %682 = vrot.lane.b32.xlu1 %v1577_v23, %s1357_s12  ;;  %s1052_s12 = sshll.u32 %s394_s26, 4  ;;  %s1783_s12 = int_to_ptr.vmem [resolvable:$true] %s1052_s12 }
 0x156   : > { %s1278_s30 = scalar_lea.vmem %s1783_s12, 128  ;;  %p1285_p2 = scmp.lt.s32.totalorder %s1783_s12, %s1283_s14 }
 0x157   : > { %p1279_p6 = scmp.ne.s32.totalorder %s1783_s12, %s1278_s30  ;;  %p1286_p3 = scmp.lt.s32.totalorder %s1284_s22, %s1278_s30 }
 0x159   : > { %708 = vrot.lane.b32.xlu1 %v1577_v23, %s1358_s13  ;;  %p1280_p10 = pnand %p1279_p6, %p1846_p9  ;;  %p1287_p4 = por %p1286_p3, %p1285_p2 }
 0x15b   : > { %p1281_p12 = pneg %p1280_p10 }
 0x15d   : > { %p1288_p7 = pnand %p1287_p4, %p1281_p12 }
 0x18b   : > { %v547_v26 = vpop.permute.xlu0 %546  ;;  %v520_v27 = vpop.permute.xlu1 %519 }
 0x18f   : > { %v573_v28 = vpop.permute.xlu0 %572  ;;  %v522_v29 = vpop.permute.xlu1 %521 }
 0x193   : > { %v599_v30 = vpop.permute.xlu0 %598  ;;  %v1603_v31 = vpop.permute.xlu1 %548 }
 0x197   : > { %v1605_v32 = vpop.permute.xlu0 %624  ;;  %v1607_v33 = vpop.permute.xlu1 %574 }
 0x19b   : > { %v1609_v34 = vpop.permute.xlu0 %650  ;;  %v1611_v35 = vpop.permute.xlu1 %600 }
 0x19f   : > { %v1613_v36 = vpop.permute.xlu0 %676  ;;  %v1615_v37 = vpop.permute.xlu1 %626 }
 0x1a3   : > { %v1617_v38 = vpop.permute.xlu0 %702  ;;  %v1619_v39 = vpop.permute.xlu1 %652 }
 0x1a7   : > { %v524_v41 = vpop.permute.xlu0 %523  ;;  %v1621_v42 = vpop.permute.xlu1 %678 }
 0x1a8   : > { %v530_v48 = vsel %vm529_vm2, %v520_v27, %v524_v41  ;;  %v532_v49 = vsel %vm529_vm2, %v524_v41, %v520_v27  ;;  %v562_v27 = vld [vmem:[#allocation2 + $0x30] sm:$0xff] }
 0x1a9   : > { %v538_v56 = vmul.f32 %v534_v46, %v532_v49  ;;  %v539_v57 = vmul.f32 %v535_v47, %v530_v48 }
 0x1ab   : > { %v551_v44 = vpop.permute.xlu0 %550  ;;  %v1625_v45 = vpop.permute.xlu1 %704  ;;  %v542_v17 = vadd.f32 %v538_v56, %v515_v63  ;;  %v543_v18 = vadd.f32 %v539_v57, %v516_v62 }
 0x1ac   : > { %v555_v60 = vsel %vm554_vm3, %v547_v26, %v551_v44  ;;  %v557_v61 = vsel %vm554_vm3, %v551_v44, %v547_v26 }
 0x1ad   : > { %v564_v11 = vmul.f32 %v560_v58, %v557_v61  ;;  %v565_v12 = vmul.f32 %v561_v59, %v555_v60  ;;  %v588_v58 = vld [vmem:[#allocation2 + $0x50] sm:$0xff]  ;;  %v589_v59 = vld [vmem:[#allocation2 + $0x58] sm:$0xff] }
 0x1af   : > { %v577_v50 = vpop.permute.xlu0 %576  ;;  %v526_v51 = vpop.permute.xlu1 %525  ;;  %v569_v48 = vadd.f32 %v565_v12, %v543_v18 }
 0x1b0   : > { %v581_v8 = vsel %vm580_vm4, %v573_v28, %v577_v50  ;;  %v583_v9 = vsel %vm580_vm4, %v577_v50, %v573_v28  ;;  %v531_v15 = vsel %vm529_vm2, %v522_v29, %v526_v51  ;;  %v533_v16 = vsel %vm529_vm2, %v526_v51, %v522_v29  ;;  %v563_v28 = vld [vmem:[#allocation2 + $0x38] sm:$0xff] }
 0x1b1   : > { %v590_v23 = vmul.f32 %v586_v6, %v583_v9  ;;  %v591_v26 = vmul.f32 %v587_v7, %v581_v8  ;;  %v540_v46 = vmul.f32 %v536_v13, %v533_v16  ;;  %v541_v47 = vmul.f32 %v537_v14, %v531_v15  ;;  %v664_v6 = vld [vmem:[#allocation2 + $0xc0] sm:$0xff]  ;;  %v665_v7 = vld [vmem:[#allocation2 + $0xc8] sm:$0xff] }
 0x1b3   : > { %v603_v4 = vpop.permute.xlu0 %602  ;;  %v553_v5 = vpop.permute.xlu1 %552  ;;  %v595_v57 = vadd.f32 %v591_v26, %v569_v48 }
 0x1b4   : > { %v607_v21 = vsel %vm606_vm5, %v599_v30, %v603_v4  ;;  %v609_v22 = vsel %vm606_vm5, %v603_v4, %v599_v30  ;;  %v556_v40 = vsel %vm554_vm3, %v1603_v31, %v553_v5  ;;  %v558_v29 = vsel %vm554_vm3, %v553_v5, %v1603_v31 }
 0x1b5   : > { %v568_v30 = vadd.f32 %v564_v11, %v542_v17  ;;  %v616_v49 = vmul.f32 %v612_v19, %v609_v22  ;;  %v617_v50 = vmul.f32 %v613_v20, %v607_v21  ;;  %v566_v51 = vmul.f32 %v562_v27, %v558_v29  ;;  %v614_v19 = vld [vmem:[#allocation2 + $0x70] sm:$0xff]  ;;  %v615_v20 = vld [vmem:[#allocation2 + $0x78] sm:$0xff] }
 0x1b6   : > { %v567_v52 = vmul.f32 %v563_v28, %v556_v40  ;;  %v544_v4 = vadd.f32 %v540_v46, %v517_v1  ;;  %v545_v5 = vadd.f32 %v541_v47, %v518_v10  ;;  %v690_v1 = vld [vmem:[#allocation2 + $0xe0] sm:$0xff]  ;;  %v691_v10 = vld [vmem:[#allocation2 + $0xe8] sm:$0xff]  ;;  %v640_v28 = vld [vmem:[#allocation2 + $0xb0] sm:$0xff] }
 0x1b7   : > { %v629_v41 = vpop.permute.xlu0 %628  ;;  %v579_v44 = vpop.permute.xlu1 %578  ;;  %v594_v56 = vadd.f32 %v590_v23, %v568_v30  ;;  %v621_v11 = vadd.f32 %v617_v50, %v595_v57  ;;  %v641_v40 = vld [vmem:[#allocation2 + $0xb8] sm:$0xff] }
 0x1b8   : > { %v633_v31 = vsel %vm632_vm6, %v1605_v32, %v629_v41  ;;  %v635_v55 = vsel %vm632_vm6, %v629_v41, %v1605_v32  ;;  %v582_v60 = vsel %vm580_vm4, %v1607_v33, %v579_v44  ;;  %v584_v61 = vsel %vm580_vm4, %v579_v44, %v1607_v33 }
 0x1b9   : > { %v620_v9 = vadd.f32 %v616_v49, %v594_v56  ;;  %v642_v12 = vmul.f32 %v638_v53, %v633_v31  ;;  %v643_v13 = vmul.f32 %v639_v54, %v635_v55  ;;  %v570_v14 = vadd.f32 %v566_v51, %v544_v4  ;;  %v716_v51 = vld [vmem:[#allocation2 + $0x100] sm:$0xff]  ;;  %v666_v56 = vld [vmem:[#allocation2 + $0xd0] sm:$0xff] }
 0x1ba   : > { %v571_v33 = vadd.f32 %v567_v52, %v545_v5  ;;  %v592_v15 = vmul.f32 %v588_v58, %v584_v61  ;;  %v593_v16 = vmul.f32 %v589_v59, %v582_v60  ;;  %v667_v59 = vld [vmem:[#allocation2 + $0xd8] sm:$0xff] }
 0x1bb   : > { %v655_v62 = vpop.permute.xlu0 %654  ;;  %v605_v63 = vpop.permute.xlu1 %604  ;;  %v646_v41 = vadd.f32 %v642_v12, %v620_v9  ;;  %v647_v44 = vadd.f32 %v643_v13, %v621_v11  ;;  %v693_v9 = vld [vmem:[#allocation2 + $0xf8] sm:$0xff] }
 0x1bc   : > { %v659_v32 = vsel %vm658_vm7, %v1609_v34, %v655_v62  ;;  %v661_v8 = vsel %vm658_vm7, %v655_v62, %v1609_v34  ;;  %v608_v21 = vsel %vm606_vm5, %v1611_v35, %v605_v63  ;;  %v610_v34 = vsel %vm606_vm5, %v605_v63, %v1611_v35 }
 0x1bd   : > { %v668_v17 = vmul.f32 %v664_v6, %v659_v32  ;;  %v669_v18 = vmul.f32 %v665_v7, %v661_v8  ;;  %v596_v30 = vadd.f32 %v592_v15, %v570_v14  ;;  %v597_v48 = vadd.f32 %v593_v16, %v571_v33  ;;  %v692_v8 = vld [vmem:[#allocation2 + $0xf0] sm:$0xff] }
 0x1be   : > { %v618_v49 = vmul.f32 %v614_v19, %v610_v34  ;;  %v619_v50 = vmul.f32 %v615_v20, %v608_v21  ;;  %v718_v19 = vld [vmem:[#allocation2 + $0x110] sm:$0xff]  ;;  %v719_v20 = vld [vmem:[#allocation2 + $0x118] sm:$0xff] }
 0x1bf   : > { %v681_v22 = vpop.permute.xlu0 %680  ;;  %v631_v23 = vpop.permute.xlu1 %630  ;;  %v672_v52 = vadd.f32 %v668_v17, %v646_v41  ;;  %v673_v53 = vadd.f32 %v669_v18, %v647_v44 }
 0x1c0   : > { %v685_v26 = vsel %vm684_vm8, %v1613_v36, %v681_v22  ;;  %v687_v27 = vsel %vm684_vm8, %v681_v22, %v1613_v36  ;;  %v634_v29 = vsel %vm632_vm6, %v1615_v37, %v631_v23  ;;  %v636_v35 = vsel %vm632_vm6, %v631_v23, %v1615_v37  ;;  %v717_v36 = vld [vmem:[#allocation2 + $0x108] sm:$0xff] }
 0x1c1   : > { %v694_v46 = vmul.f32 %v690_v1, %v685_v26  ;;  %v695_v47 = vmul.f32 %v691_v10, %v687_v27  ;;  %v644_v54 = vmul.f32 %v640_v28, %v634_v29  ;;  %v645_v31 = vmul.f32 %v641_v40, %v636_v35 }
 0x1c2   : > { %v622_v6 = vadd.f32 %v618_v49, %v596_v30  ;;  %v623_v7 = vadd.f32 %v619_v50, %v597_v48 }
 0x1c3   : > { %v707_v55 = vpop.permute.xlu0 %706  ;;  %v657_v57 = vpop.permute.xlu1 %656  ;;  %v698_v62 = vadd.f32 %v694_v46, %v672_v52  ;;  %v699_v63 = vadd.f32 %v695_v47, %v673_v53  ;;  %v757_v52 = vld [vmem:[%s1828_s5] sm:$0xf] }
 0x1c4   : > { %v711_v37 = vsel %vm710_vm9, %v1617_v38, %v707_v55  ;;  %v713_v58 = vsel %vm710_vm9, %v707_v55, %v1617_v38  ;;  %v660_v60 = vsel %vm658_vm7, %v1619_v39, %v657_v57  ;;  %v662_v61 = vsel %vm658_vm7, %v657_v57, %v1619_v39  ;;  %v837_v57 = vld [vmem:[%s1831_s8 + $0x8] sm:$0xff] }
 0x1c5   : > { %v720_v4 = vmul.f32 %v716_v51, %v711_v37  ;;  %v721_v5 = vmul.f32 %v717_v36, %v713_v58  ;;  %v670_v32 = vmul.f32 %v666_v56, %v660_v60  ;;  %v671_v12 = vmul.f32 %v667_v59, %v662_v61  ;;  %v835_v56 = vld [vmem:[%s1830_s7 + $0x8] sm:$0xff]  ;;  %v836_v37 = vld [vmem:[%s1831_s8] sm:$0xff] }
 0x1c6   : > { %v648_v14 = vadd.f32 %v644_v54, %v622_v6  ;;  %v649_v33 = vadd.f32 %v645_v31, %v623_v7 }
 0x1c7   : > { %v724_v11 = vadd.f32 %v720_v4, %v698_v62  ;;  %v725_v38 = vadd.f32 %v721_v5, %v699_v63  ;;  %v683_v13 = vpop.permute.xlu1 %682 }
 0x1c8   : > { %v686_v15 = vsel %vm684_vm8, %v1621_v42, %v683_v13  ;;  %v688_v39 = vsel %vm684_vm8, %v683_v13, %v1621_v42  ;;  %v674_v18 = vadd.f32 %v670_v32, %v648_v14  ;;  %v675_v21 = vadd.f32 %v671_v12, %v649_v33 }
 0x1c9   : > { %v696_v16 = vmul.f32 %v692_v8, %v686_v15  ;;  %v697_v1 = vmul.f32 %v693_v9, %v688_v39  ;;  %v1720_v10 = vadd.f32 %v1601_v25, %v724_v11  ;;  %v1723_v17 = vadd.f32 %v1601_v25, %v725_v38  ;;  %v949_v9 = vld [vmem:[%s1833_s10] sm:$0xf] }
 0x1cb   : > { %v709_v34 = vpop.permute.xlu1 %708  ;;  %v744_v22 = vmax.f32 %v1720_v10, 0.0  ;;  %v745_v23 = vmax.f32 %v1723_v17, 0.0  ;;  %v700_v26 = vadd.f32 %v696_v16, %v674_v18  ;;  %v701_v25 = vadd.f32 %v697_v1, %v675_v21  ;;  %v948_v16 = vld [vmem:[%s1832_s9] sm:$0xf] }
 0x1cc   : > { %v712_v42 = vsel %vm710_vm9, %v1625_v45, %v709_v34  ;;  %v714_v27 = vsel %vm710_vm9, %v709_v34, %v1625_v45 }
 0x1cd   : > { %v722_v28 = vmul.f32 %v718_v19, %v712_v42  ;;  %v723_v40 = vmul.f32 %v719_v20, %v714_v27  ;;  %v748_v29 = vadd.f32 %v745_v23, %v744_v22 }
 0x1cf   : > { %v726_v35 = vadd.f32 %v722_v28, %v700_v26  ;;  %v727_v41 = vadd.f32 %v723_v40, %v701_v25  ;;  %749 = vadd.xlane.f32.xlu0 %v748_v29 }
 0x1d1   : > { %v742_v44 = vadd.f32 %v1599_v24, %v726_v35  ;;  %v743_v46 = vadd.f32 %v1599_v24, %v727_v41  ;;  %v834_v24 = vld [vmem:[%s1830_s7] sm:$0xff] }
 0x1d3   : > { %v746_v47 = vmax.f32 %v742_v44, 0.0  ;;  %v747_v30 = vmax.f32 %v743_v46, 0.0 }
 0x1d5   : > { %v751_v48 = vadd.f32 %v747_v30, %v746_v47 }
 0x1d7   : > { %752 = vadd.xlane.f32.xlu1 %v751_v48 }
 0x25c   : > { %v750_v45 = vpop.xlane.xlu0 %749 }
 0x25d   : > { %v755_v50 = vmul.f32 0.00390625, %v750_v45 }
 0x264   : > { %v753_v49 = vpop.xlane.xlu1 %752 }
 0x265   : > { %v756_v51 = vmul.f32 0.00390625, %v753_v49 }
 0x267   : > { %v1169_v36 = vpack.c.bf16 %v756_v51, %v755_v50 }
 0x269   : > { %1170 = vmatpush3.bf16.msra.mxu1 %v1169_v36 }
 0x26c   : > { %1161 = vmatmul.mubr.msk.f32.vlgmr.msra.gmra.mrb[0].mxu1 %vm759_vm11, %v757_v52 }
 0x26d   : > { %1165 = vmatprep.mubr.msk.f32.mxu1 %vm417_vm1, %v834_v24 }
 0x33f   : > { %v829_v53 = vpop.f32.mrb[0].mxu1 }
 0x340   : > { %v830_v54 = vadd.f32 %v829_v53, %v758_v0  ;;  %v1162_v31 = vpop.f32.mrb[1].mxu1 }
 0x342   : > { %v833_v55 = vmax.f32 %v830_v54, 0.0 }
 0x344   : > { %1163 = vmatprep.subr.msk.mxu1 %vm424_vm0, %v833_v55 }
 0x345   : > { %1164 = vmatpush3.msk.msra.mxu1 %vm424_vm0, %v833_v55 }
 0x346   : > { %1166 = vmatmul.mubr.msk.f32.vlgmr.msra.gmra.mrb[2].mxu1 %vm417_vm1, %v835_v56 }
 0x419   : > { %v1167_v58 = vpop.f32.mrb[2].mxu1 }
 0x41a   : > { %v919_v59 = vadd.f32 %v1167_v58, %v837_v57  ;;  %v913_v60 = vpop.f32.mrb[3].mxu1 }
 0x41b   : > { %v914_v61 = vadd.f32 %v913_v60, %v836_v37 }
 0x41c   : > { %v1141_v62 = vmul.f32 -1.442695, %v919_v59 }
 0x41d   : > { %v1140_v63 = vmul.f32 -1.442695, %v914_v61 }
 0x41e   : > { %1242 = vpow2.f32 %v1141_v62 }
 0x41f   : > { %1244 = vpow2.f32 %v1140_v63 }
 0x428   : > { %v1243_v4 = vpop.eup %1242 }
 0x429   : > { %v1245_v5 = vpop.eup %1244  ;;  %v929_v6 = vadd.f32 1.0, %v1243_v4 }
 0x42a   : > { %v928_v7 = vadd.f32 1.0, %v1245_v5 }
 0x42b   : > { %1246 = vrcp.f32 %v929_v6 }
 0x42c   : > { %1248 = vrcp.f32 %v928_v7 }
 0x435   : > { %v1247_v32 = vpop.eup %1246 }
 0x436   : > { %v1249_v8 = vpop.eup %1248  ;;  %941 = vperm.xlu1 %1240, %v1247_v32  }
 0x437   : > { %936 = vperm.xlu0 %1239, %v1249_v8  }
 0x43b   : > { %952 = vperm.xlu0 %1239, %v949_v9  }
 0x4b5   : > { %v942_v11 = vpop.permute.xlu1 %941 }
 0x4b6   : > { %v946_v38 = vmul.f32 %v942_v11, %v746_v47  ;;  %v947_v12 = vmul.f32 %v942_v11, %v747_v30  ;;  %v937_v13 = vpop.permute.xlu0 %936 }
 0x4b7   : > { %v944_v14 = vmul.f32 %v937_v13, %v744_v22  ;;  %v945_v33 = vmul.f32 %v937_v13, %v745_v23 }
 0x4b9   : > { %v1171_v15 = vpack.c.bf16 %v947_v12, %v945_v33  ;;  %v1173_v39 = vpack.c.bf16 %v946_v38, %v944_v14 }
 0x4ba   : > { %v953_v1 = vpop.permute.xlu0 %952 }
 0x4bb   : > { %1172 = vmatprep.subr.bf16.mxu0 %v1171_v15 }
 0x4bc   : > { %1174 = vmatpush1.bf16.msra.mxu0 %v1173_v39 }
 0x4bf   : > { %1142 = vmatmul.mubr.msk.f32.vlgmr.msra.gmra.mrb[4].mxu0 %vm759_vm11, %v948_v16 }
 0x592   : > { %v1024_v18 = vpop.f32.mrb[4].mxu0 }
 0x593   : > { %v1025_v10 = vadd.f32 %v1024_v18, %v953_v1  ;;  %v1026_v19 = vpop.f32.mrb[5].mxu0 }
 0x594   : > { %v1027_v17 = vadd.f32 %v1026_v19, %v953_v1 }
 0x595   : > { %v1030_v20 = vadd.f32 %v1025_v10, %v1511_v2 }
 0x596   : > { %v1031_v21 = vadd.f32 %v1027_v17, %v1515_v3 }
 0x598   : > { %v1034_v34 = vcombine.low %v1030_v20, %v1031_v21 }
 0x59a   : > { %1036 = vst [vmem:[%s394_s26] sm:$0xff] %v1034_v34 }
 0x59b   : > { %1291 = shalt.err (!%p1288_p7)
}
 0x59c   : > { %s1292_s15 = scalar_lea.hbm %s1781_s16, 128  ;;  %s1296_s13 = scalar_lea.hbm %s1834_s11, 256 }
 0x59d   : > { %p1293_p8 = scmp.ne.s32.totalorder %s1781_s16, %s1292_s15  ;;  %p1297_p1 = scmp.lt.u32.totalorder %s1781_s16, %s1834_s11 }
 0x59e   : > { %p1298_p0 = scmp.lt.u32.totalorder %s1296_s13, %s1292_s15  ;;  %p1300_p6 = scmp.lt.u32.totalorder %s1292_s15, %s1781_s16 }
 0x59f   : > { %p1294_p11 = pnand %p1293_p8, %p1846_p9 }
 0x5a0   : > { %p1299_p5 = por %p1298_p0, %p1297_p1 }
 0x5a1   : > { %p1295_p13 = pneg %p1294_p11 }
 0x5a2   : > { %p1301_p10 = por %p1300_p6, %p1299_p5 }
 0x5a4   : > { %p1302_p12 = pnand %p1301_p10, %p1295_p13 }
 0x5a6   : > { %1305 = shalt.err (!%p1302_p12)
}
 0x5a7   : > { %1179 = dma.vmem_to_hbm [thread:$0]  (%p1846_p9), %s1783_s12, 128, %s1781_s16, %s1038_s25  }
 0x5a8 PF: > { %p1191_p2 = scmp.ge.s32.totalorder %s1344_s20, 2  ;;  %s1064_s30 = sand.u32 1, %s1332_s17  }
 0x5a9   : > { %p1847_p3 = scmp.ne.s32.totalorder %s1840_s28, 0  ;;  %s1065_s14 = scalar_lea.sflag [#allocation4], %s1064_s30 }
 0x5ab   : > { %p1186_p4 = pnand %p1191_p2, %p1847_p3 }
 0x5ad   : > { %1327 = dma.done.wait (!%p1186_p4), %s1065_s14, 128  }
 0x5ae   : > { %1329 = vsyncadd (!%p1186_p4), %s1065_s14, 4294967168  ;;  %s1848_s22 = sld [smem:[#allocation8_spill]]  ;;  %p22_p7 = scmp.ge.s32.totalorder %s1447_s23, 4  }
 0x5af   : > { %s1849_s17 = smov %s1336_s18  ;;  %s1850_s18 = smov %s1340_s19 }
 0x5b0   : > { %s1852_s20 = smov %s1447_s23  ;;  %24 = sbr.rel (!%p22_p7) target bundleno = 4 (0x4), region = 112 }
 0x5b4   : > { %s1851_s19 = smov %s1848_s22 }
 0x5b7   :  { %1070 = vsyncpa [#allocation3], 1 }
 0x5b8   :  { %1072 = vsyncpa [#allocation3 + $0x1], 1 }
 0x5b9   :  { %1073 = vsyncpa [#allocation4], 1 }
 0x5ba   :  { %1075 = vsyncpa [#allocation4 + $0x1], 1 }

</bundles_post_ra>
